<compile_context>
chip_gen: v7x
topology: tpu7x:2x2x1
jax: 0.10.0
libtpu: 0.0.40
codegen_flags: <defaults>
</compile_context>

<pallas_src>
import functools

import jax
import jax.numpy as jnp
from jax import lax
from jax.experimental import pallas as pl
from jax.experimental.pallas import tpu as pltpu


def _round_up(x, m):
    return ((x + m - 1) // m) * m


def _flops_kernel(x_ref, o_ref, acc_ref, *, tile_b, group, need_mask, tail_rows):
    j = pl.program_id(1)                 # batch-tile index (inner, "arbitrary")
    nb = pl.num_programs(1)

    @pl.when(j == 0)
    def _init():
        acc_ref[...] = jnp.zeros_like(acc_ref)

    grouped = (tile_b % group == 0)

    def _accumulate(mask_tail):
        if grouped:
            # Grouped, VPU-only accumulation; group matches the packed sublane
            # tile of the input dtype (8 f32 / 16 bf16 / 32 int8 rows).
            parts = []
            for g in range(tile_b // group):
                lo, hi = g * group, (g + 1) * group
                if mask_tail and lo >= tail_rows:
                    continue             # fully-garbage rows of the padded tail
                xs = jnp.abs(x_ref[lo:hi, :].astype(jnp.float32))
                if mask_tail and hi > tail_rows:
                    # Only the single straddling group pays the mask.
                    row_ids = lax.broadcasted_iota(jnp.int32, (group, 1), 0) + lo
                    xs = jnp.where(row_ids < tail_rows, xs, 0.0)
                parts.append(xs)
            part = parts[0]
            for p in parts[1:]:
                part = part + p
        else:
            # Tiny / irregular full-batch tile (nb == 1): plain sublane reduce.
            xs = jnp.abs(x_ref[...].astype(jnp.float32))
            if mask_tail:
                row_ids = lax.broadcasted_iota(jnp.int32, (tile_b, 1), 0)
                xs = jnp.where(row_ids < tail_rows, xs, 0.0)
            part = jnp.sum(xs, axis=0, keepdims=True)
        acc_ref[...] += part

    if need_mask:
        @pl.when(j < nb - 1)
        def _full_tiles():
            _accumulate(mask_tail=False)

        @pl.when(j == nb - 1)
        def _tail_tile():
            _accumulate(mask_tail=True)
    else:
        _accumulate(mask_tail=False)

    @pl.when(j == nb - 1)
    def _finish():
        # One cross-sublane reduce per feature tile, then a lane-dense store of
        # the per-feature (sum_b |x|)^2 partials.  No cross-lane ops: ragged-D
        # garbage lanes stay in their own lanes and are discarded on writeback.
        s = jnp.sum(acc_ref[...], axis=0, keepdims=True)   # (1, tile_d)
        o_ref[...] = s * s


def _input_spec(tile_b, tile_d, nb):
    idx = lambda i, j: (j, i)
    if nb >= 3 and hasattr(pl, "Buffered"):
        try:
            return pl.BlockSpec((tile_b, tile_d), idx, pipeline_mode=pl.Buffered(3))
        except TypeError:
            pass
    return pl.BlockSpec((tile_b, tile_d), idx)


def flops_loss(batch_rep, *, target_tile_d=1024,
               target_block_bytes=4 * 1024 * 1024, max_tile_b=1024):
    """Pallas TPU implementation of FLOPS.forward. Returns a float32 scalar."""
    B, D = batch_rep.shape
    itemsize = jnp.dtype(batch_rep.dtype).itemsize
    # Dtype-aware sublane group: 8 rows/vreg f32, 16 bf16, 32 int8/fp8.
    group = max(8, 32 // itemsize)

    # ---- feature (lane) tile ----
    if D <= target_tile_d:
        if D >= 256:
            # Split D into >= 2 lane-dense, 128-aligned tiles so the "parallel"
            # feature axis feeds both v7x TensorCores (no-op on v5e/v6e).
            tile_d = min(target_tile_d, _round_up(pl.cdiv(D, 2), 128))
        else:
            tile_d = D
    else:
        tile_d = target_tile_d

    # ---- batch (sublane) tile: ~target_block_bytes per grid step ----
    rows = max(group, target_block_bytes // (tile_d * itemsize))
    rows = max(group, min(max_tile_b, (rows // group) * group))
    tile_b = B if B <= rows else rows

    nd, nb = pl.cdiv(D, tile_d), pl.cdiv(B, tile_b)
    need_mask = (B % tile_b) != 0          # only possible when nb >= 2
    tail_rows = (B % tile_b) if need_mask else tile_b
    grouped = (tile_b % group == 0)
    acc_rows = group if grouped else 1

    kernel = functools.partial(_flops_kernel, tile_b=tile_b, group=group,
                               need_mask=need_mask, tail_rows=tail_rows)

    # VMEM limit derived from the actual footprint (input buffers + output
    # double-buffer + accumulator) with headroom; stays far under v7x's 64 MiB.
    n_buf_in = 3 if nb >= 3 else 2
    vmem_bytes = (n_buf_in * tile_b * tile_d * itemsize
                  + 2 * 1 * tile_d * 4
                  + acc_rows * tile_d * 4)
    vmem_limit = int(max(16 * 1024 * 1024, vmem_bytes + 4 * 1024 * 1024))

    per_feature = pl.pallas_call(
        kernel,
        out_shape=jax.ShapeDtypeStruct((1, D), jnp.float32),
        grid_spec=pltpu.PrefetchScalarGridSpec(
            num_scalar_prefetch=0,
            grid=(nd, nb),
            in_specs=[_input_spec(tile_b, tile_d, nb)],
            out_specs=pl.BlockSpec((1, tile_d), lambda i, j: (0, i)),
            scratch_shapes=[pltpu.VMEM((acc_rows, tile_d), jnp.float32)],
        ),
        compiler_params=pltpu.CompilerParams(
            # Feature tiles are independent -> megacore-parallel; batch is the
            # sequential reduction axis owning the resident accumulator.
            dimension_semantics=("parallel", "arbitrary"),
            vmem_limit_bytes=vmem_limit,
        ),
    )(batch_rep)

    # sum_d (sum_b |x|)^2 / B^2  ==  sum_d (mean_b |x|)^2
    return jnp.sum(per_feature) / jnp.float32(B * B)


def _reference(batch_rep):
    x = batch_rep.astype(jnp.float32)
    return jnp.sum(jnp.mean(jnp.abs(x), axis=0) ** 2)


if __name__ == "__main__":
    key = jax.random.PRNGKey(0)

    # Primary small, (8,128)-aligned demo shape; D split into 2 feature tiles.
    B, D = 8, 256
    batch_rep = jax.random.normal(key, (B, D), dtype=jnp.float32)
    result = jax.block_until_ready(flops_loss(batch_rep))
    ref = _reference(batch_rep)
    assert jnp.allclose(result, ref, rtol=1e-5, atol=1e-5), (result, ref)

    # Ragged small shape: full-dim (non-multiple-of-8/128) block path.
    x2 = jax.random.normal(jax.random.PRNGKey(1), (10, 200), dtype=jnp.float32)
    r2 = jax.block_until_ready(flops_loss(x2))
    assert jnp.allclose(r2, _reference(x2), rtol=1e-5, atol=1e-5), r2

    # Batch-tiled path: multiple batch tiles, masked tail tile, ragged D,
    # 2 feature tiles, Buffered(3) input pipeline (forced via max_tile_b).
    x3 = jax.random.normal(jax.random.PRNGKey(2), (150, 300), dtype=jnp.float32)
    r3 = jax.block_until_ready(flops_loss(x3, max_tile_b=64))
    assert jnp.allclose(r3, _reference(x3), rtol=1e-5, atol=1e-5), r3

    # bf16 path: dtype-aware 16-row groups, f32 accumulation.
    x4 = jax.random.normal(jax.random.PRNGKey(3), (32, 256)).astype(jnp.bfloat16)
    r4 = jax.block_until_ready(flops_loss(x4))
    assert jnp.allclose(r4, _reference(x4), rtol=1e-4, atol=1e-4), r4

    print("KERNEL_OK")
</pallas_src>

<mosaic_0001>
module attributes {stable_mosaic.version = 11 : i64} {
  func.func @_flops_kernel(%arg0: i32, %arg1: i32, %arg2: memref<8x128xf32, #tpu.memory_space<vmem>>, %arg3: memref<1x128xf32, #tpu.memory_space<vmem>>, %arg4: memref<8x128xf32, #tpu.memory_space<vmem>>) attributes {dimension_semantics = [#tpu.dimension_semantics<parallel>, #tpu.dimension_semantics<arbitrary>], iteration_bounds = array<i64: 2, 1>, scalar_prefetch = 0 : i64, scratch_operands = 1 : i64, tpu.core_type = #tpu.core_type<tc>, window_params = [{transform_indices = @transform_0, window_bounds = array<i64: 8, 128>}, {transform_indices = @transform_1, window_bounds = array<i64: 1, 128>}]} {
    %c0_i32 = arith.constant 0 : i32
    %0 = arith.cmpi eq, %arg1, %c0_i32 : i32
    %1 = arith.extui %0 : i1 to i32
    %c0_i32_0 = arith.constant 0 : i32
    %2 = arith.cmpi ne, %1, %c0_i32_0 : i32
    scf.if %2 {
      %cst = arith.constant 0.000000e+00 : f32
      %11 = vector.broadcast %cst : f32 to vector<8x128xf32>
      %c0_8 = arith.constant 0 : index
      %c0_9 = arith.constant 0 : index
      %12 = vector.load %arg4[%c0_8, %c0_9] : memref<8x128xf32, #tpu.memory_space<vmem>>, vector<8x128xf32>
      tpu.vector_store %arg4[%c0_8, %c0_9], %11 {strides = array<i32>} : memref<8x128xf32, #tpu.memory_space<vmem>>, vector<8x128xf32>,
    } else {
    }
    %c0 = arith.constant 0 : index
    %c0_1 = arith.constant 0 : index
    %3 = vector.load %arg2[%c0, %c0_1] : memref<8x128xf32, #tpu.memory_space<vmem>>, vector<8x128xf32>
    %4 = math.absf %3 : vector<8x128xf32>
    %c0_2 = arith.constant 0 : index
    %c0_3 = arith.constant 0 : index
    %5 = vector.load %arg4[%c0_2, %c0_3] : memref<8x128xf32, #tpu.memory_space<vmem>>, vector<8x128xf32>
    %6 = arith.addf %5, %4 : vector<8x128xf32>
    %c0_4 = arith.constant 0 : index
    %c0_5 = arith.constant 0 : index
    %7 = vector.load %arg4[%c0_4, %c0_5] : memref<8x128xf32, #tpu.memory_space<vmem>>, vector<8x128xf32>
    tpu.vector_store %arg4[%c0_4, %c0_5], %6 {strides = array<i32>} : memref<8x128xf32, #tpu.memory_space<vmem>>, vector<8x128xf32>,
    %c0_i32_6 = arith.constant 0 : i32
    %8 = arith.cmpi eq, %arg1, %c0_i32_6 : i32
    %9 = arith.extui %8 : i1 to i32
    %c0_i32_7 = arith.constant 0 : i32
    %10 = arith.cmpi ne, %9, %c0_i32_7 : i32
    scf.if %10 {
      %c0_8 = arith.constant 0 : index
      %c0_9 = arith.constant 0 : index
      %11 = vector.load %arg4[%c0_8, %c0_9] : memref<8x128xf32, #tpu.memory_space<vmem>>, vector<8x128xf32>
      %cst = arith.constant dense<0.000000e+00> : vector<128xf32>
      %12 = vector.multi_reduction <add>, %11, %cst [0] : vector<8x128xf32> to vector<128xf32>
      %13 = vector.shape_cast %12 : vector<128xf32> to vector<1x128xf32>
      %14 = arith.mulf %13, %13 : vector<1x128xf32>
      %c0_10 = arith.constant 0 : index
      %c0_11 = arith.constant 0 : index
      %15 = vector.load %arg3[%c0_10, %c0_11] : memref<1x128xf32, #tpu.memory_space<vmem>>, vector<1x128xf32>
      tpu.vector_store %arg3[%c0_10, %c0_11], %14 {strides = array<i32>} : memref<1x128xf32, #tpu.memory_space<vmem>>, vector<1x128xf32>,
    } else {
    }
    return
  }
  func.func @transform_0(%arg0: i32, %arg1: i32) -> (i32, i32) {
    %c0_i32 = arith.constant 0 : i32
    return %arg1, %arg0 : i32, i32
  }
  func.func @transform_1(%arg0: i32, %arg1: i32) -> (i32, i32) {
    %c0_i32 = arith.constant 0 : i32
    %c0_i32_0 = arith.constant 0 : i32
    return %c0_i32, %arg0 : i32, i32
  }
}

</mosaic_0001>

<bundles_post_ra>
// kernel: tpu_custom_call.1
= control target key start
LH: loop header
LB: loop body
LE: loop exit
PB: predicated region body
PF: predicated region fallthrough
CT: control target
= control target key end

     0   :  { %6 = vsyncpa [#allocation4], 0  ;;  %s630_s0 = inlined_call_operand.hbm [shape: f32[8,256], index: 0, kind: input, shape index: {}]   ;;  %s631_s1 = inlined_call_operand.hbm [shape: f32[1,256], index: 1, kind: output, shape index: {}]  }
   0x1   :  { %8 = vsyncpa [#allocation4 + $0x1], 0 }
   0x2   :  { %9 = vsyncpa [#allocation5], 0 }
   0x3   :  { %11 = vsyncpa [#allocation5 + $0x1], 0  ;;  %s457_s6 = smov 0   ;;  %s459_s7 = smov 0  }
   0x4   :  { %s461_s8 = smov 0   ;;  %s463_s9 = smov 0  }
   0x5   :  { %s465_s10 = smov 0   ;;  %s467_s11 = smov 0  }
   0x6 LB: > { %s258_s12 = sadd.s32 4294967295, %s443_s11   ;;  %s259_s13 = sadd.s32 4294967294, %s443_s11   ;;  %s443_s11 = sphi %s467_s11, %s17_s11   ;;  %s439_s10 = sphi %s465_s10, %s647_s10   ;;  %s435_s9 = sphi %s463_s9, %s646_s9   ;;  %s431_s8 = sphi %s461_s8, %s645_s8   ;;  %s427_s7 = sphi %s459_s7, %s644_s7   ;;  %s423_s6 = sphi %s457_s6, %s643_s6  }
   0x7   : > { %s29_s14 = sadd.s32 1, %s439_s10  ;;  %s38_s15 = sadd.s32 1, %s431_s8 }
   0x8   : > { %p31_p0 = scmp.ge.s32.totalorder %s29_s14, 2  ;;  %p45_p1 = scmp.ne.s32.totalorder %s431_s8, %s427_s7 }
   0x9   : > { %p46_p2 = scmp.eq.s32.totalorder %s443_s11, 0  ;;  %p51_p3 = scmp.ne.s32.totalorder %s427_s7, %s423_s6 }
   0xa   : > { %s649_s14 = smov (%p31_p0, %s29_s14), 0  ;;  %p52_p5 = scmp.eq.s32.totalorder %s258_s12, 0 }
   0xb   : > { %p498_p4 = por %p46_p2, %p45_p1  ;;  %s34_s17 = ssub.s32 %s439_s10, %s649_s14 }
   0xc   : > { %p75_p6 = scmp.eq.s32.totalorder %s258_s12, 1  ;;  %p36_p7 = scmp.eq.s32.totalorder %s34_s17, 0 }
   0xd   : > { %p504_p8 = por %p52_p5, %p51_p3  ;;  %p81_p10 = scmp.eq.s32.totalorder %s259_s13, 1 }
   0xe   : > { %p508_p9 = por %p75_p6, %p45_p1  ;;  %p281_p13 = scmp.lt.s32.totalorder %s443_s11, 2 }
   0xf   : > { %s513_s20 = scalar_select %p36_p7, %s431_s8, %s38_s15  }
  0x10   : > { %s635_s19 = scalar_select %p508_p9, 1, 0 }
  0x11   : > { %p515_p11 = por %p81_p10, %p51_p3  ;;  %s101_s22 = sand.u32 1, %s431_s8  }
  0x12   : > { %s262_s23 = sshll.u32 %s101_s22, 3  ;;  %s263_s24 = sshll.u32 %s439_s10, 7 }
  0x13   : > { %s636_s21 = scalar_select %p515_p11, 1, 0 }
  0x14   : > { %s526_s27 = scalar_lea.hbm %s630_s0, %s263_s24  ;;  %s105_s28 = scalar_lea.vmem [#allocation3], %s262_s23 }
  0x15   : > { %s114_s29 = sshll.u32 %s105_s28, 4  ;;  %p532_p0 = pnand %p281_p13, %p498_p4  ;;  %s528_s29 = int_to_ptr.vmem [resolvable:$true] %s114_s29 }
  0x16   : > { %s102_s2 = scalar_lea.sflag [#allocation4], %s101_s22  ;;  %s331_s3 = scalar_lea.hbm %s526_s27, 128 }
  0x17   : > { %p332_p3 = scmp.ne.s32.totalorder %s526_s27, %s331_s3  ;;  %p333_p5 = pneg %p532_p0 }
  0x18   : > { %s336_s12 = scalar_lea.hbm %s630_s0, 256  ;;  %p337_p4 = scmp.lt.u32.totalorder %s526_s27, %s630_s0 }
  0x19   : > { %p334_p6 = pnand %p333_p5, %p332_p3  ;;  %p338_p10 = scmp.lt.u32.totalorder %s336_s12, %s331_s3 }
  0x1a   : > { %p340_p12 = scmp.lt.u32.totalorder %s331_s3, %s526_s27 }
  0x1b   : > { %p335_p7 = pneg %p334_p6  ;;  %p339_p13 = por %p338_p10, %p337_p4 }
  0x1d   : > { %p341_p1 = por %p340_p12, %p339_p13 }
  0x1f   : > { %p342_p2 = pnand %p341_p1, %p335_p7 }
  0x21   : > { %345 = shalt.err (!%p342_p2)
}
  0x22   : > { %s346_s16 = scalar_lea.vmem %s528_s29, 128  ;;  %s445_s17 = smov [#allocation3]  }
  0x23   : > { %p347_p3 = scmp.ne.s32.totalorder %s528_s29, %s346_s16  ;;  %s351_s22 = sshll.u32 %s445_s17, 4  ;;  %s352_s22 = int_to_ptr.vmem [resolvable:$false] %s351_s22 }
  0x24   : > { %s353_s23 = scalar_lea.vmem %s352_s22, 256  ;;  %p354_p9 = scmp.lt.s32.totalorder %s528_s29, %s352_s22 }
  0x25   : > { %p349_p6 = pnand %p347_p3, %p333_p5  ;;  %p355_p4 = scmp.lt.s32.totalorder %s353_s23, %s346_s16 }
  0x27   : > { %p350_p11 = pneg %p349_p6  ;;  %p356_p10 = por %p355_p4, %p354_p9 }
  0x29   : > { %p357_p12 = pnand %p356_p10, %p350_p11 }
  0x2b   : > { %360 = shalt.err (!%p357_p12)
}
  0x2c   : > { %276 = dma.hbm_to_vmem [thread:$0]  (!%p532_p0), %s526_s27, 128, %s528_s29, %s102_s2  }
  0x2d   : > { %p638_p1 = scmp.lt.s32.totalorder %s443_s11, 3  ;;  %p639_p2 = scmp.ge.s32.totalorder %s443_s11, 1 }
  0x2f   : > { %p120_p5 = pnand %p639_p2, %p638_p1 }
  0x30   : > { %s568_s24 = sand.u32 (!%p120_p5), 1, %s427_s7  }
  0x31   : > { %123 = sbr.rel (%p120_p5) target bundleno = 88 (0x58), region = 24  ;;  %s265_s25 = sshll.u32 (!%p120_p5), %s568_s24, 3 }
  0x32   : > { %s126_s26 = scalar_lea.sflag (!%p120_p5), [#allocation4], %s568_s24  ;;  %s129_s28 = scalar_lea.vmem (!%p120_p5), [#allocation3], %s265_s25 }
  0x38   : > { %414 = dma.done.wait (%p504_p8), %s126_s26, 128  }
  0x39   : > { %416 = vsyncadd (%p504_p8), %s126_s26, 4294967168  ;;  %v152_v0 = vld [vmem:[%s129_s28] sm:$0xff]  ;;  %s146_s27 = scalar_lea.vmem [#allocation6], %s568_s24  ;;  %s266_s30 = sshll.u32 %s435_s9, 4 }
  0x3a   : > { %v153_v1 = vand.u32 2147483647, %v152_v0  ;;  %s182_s29 = sshll.u32 %s146_s27, 4  ;;  %s583_s3 = scalar_lea.hbm %s631_s1, %s266_s30  ;;  %s578_s29 = int_to_ptr.vmem [resolvable:$true] %s182_s29 }
  0x3b   : > { %s170_s4 = scalar_lea.sflag [#allocation5], %s568_s24  ;;  %s361_s5 = scalar_lea.vmem %s578_s29, 16 }
  0x3c   : > { %v161_v2 = vrot.slane %v153_v1, 4  ;;  %p362_p8 = scmp.ne.s32.totalorder %s578_s29, %s361_s5  ;;  %p640_p9 = scmp.ne.s32.totalorder %s635_s19, 0 }
  0x3d   : > { %s446_s9 = smov [#allocation6]  }
  0x3e   : > { %v162_v3 = vadd.f32 %v161_v2, %v153_v1  ;;  %p363_p11 = pnand %p362_p8, %p640_p9  ;;  %s365_s12 = sshll.u32 %s446_s9, 4  ;;  %s366_s12 = int_to_ptr.vmem [resolvable:$false] %s365_s12 }
  0x3f   : > { %s367_s13 = scalar_lea.vmem %s366_s12, 32  ;;  %p368_p7 = scmp.lt.s32.totalorder %s578_s29, %s366_s12 }
  0x40   : > { %v163_v4 = vrot.slane %v162_v3, 2  ;;  %p364_p0 = pneg %p363_p11  ;;  %p369_p13 = scmp.lt.s32.totalorder %s367_s13, %s361_s5 }
  0x42   : > { %v164_v5 = vadd.f32 %v163_v4, %v162_v3  ;;  %p370_p3 = por %p369_p13, %p368_p7 }
  0x44   : > { %v165_v6 = vrot.slane %v164_v5, 1  ;;  %p371_p6 = pnand %p370_p3, %p364_p0 }
  0x46   : > { %v166_v7 = vadd.f32 %v165_v6, %v164_v5 }
  0x48   : > { %v167_v8 = vmul.f32 %v166_v7, %v166_v7 }
  0x4a   : > { %168 = vst [vmem:[%s146_s27] sm:$0x1] %v167_v8 }
  0x4b   : > { %374 = shalt.err (!%p371_p6)
}
  0x4c   : > { %s375_s15 = scalar_lea.hbm %s583_s3, 16  ;;  %s379_s22 = scalar_lea.hbm %s631_s1, 32 }
  0x4d   : > { %p376_p4 = scmp.ne.s32.totalorder %s583_s3, %s375_s15  ;;  %p380_p1 = scmp.lt.u32.totalorder %s583_s3, %s631_s1 }
  0x4e   : > { %p381_p2 = scmp.lt.u32.totalorder %s379_s22, %s375_s15  ;;  %p383_p8 = scmp.lt.u32.totalorder %s375_s15, %s583_s3 }
  0x4f   : > { %p377_p10 = pnand %p376_p4, %p640_p9 }
  0x50   : > { %p382_p5 = por %p381_p2, %p380_p1 }
  0x51   : > { %p378_p12 = pneg %p377_p10 }
  0x52   : > { %p384_p11 = por %p383_p8, %p382_p5 }
  0x54   : > { %p385_p0 = pnand %p384_p11, %p378_p12 }
  0x56   : > { %388 = shalt.err (!%p385_p0)
}
  0x57   : > { %271 = dma.vmem_to_hbm [thread:$0]  (%p640_p9), %s578_s29, 16, %s583_s3, %s170_s4  }
  0x58 PF: > { %s194_s25 = sand.u32 1, %s423_s6   ;;  %p641_p7 = scmp.ne.s32.totalorder %s636_s21, 0 }
  0x59   : > { %p642_p13 = scmp.ge.s32.totalorder %s443_s11, 2  ;;  %s195_s26 = scalar_lea.sflag [#allocation5], %s194_s25 }
  0x5b   : > { %p278_p3 = pnand %p642_p13, %p641_p7 }
  0x5d   : > { %418 = dma.done.wait (!%p278_p3), %s195_s26, 16  }
  0x5e   : > { %420 = vsyncadd (!%p278_p3), %s195_s26, 4294967280  ;;  %s17_s11 = sadd.s32 1, %s443_s11   ;;  %s643_s6 = smov %s427_s7 }
  0x5f   : > { %p14_p6 = scmp.ge.s32.totalorder %s17_s11, 4   ;;  %s644_s7 = smov %s431_s8 }
  0x60   : > { %s645_s8 = smov %s513_s20  ;;  %s646_s9 = smov %s439_s10 }
  0x61   : > { %s647_s10 = smov %s649_s14  ;;  %16 = sbr.rel (!%p14_p6) target bundleno = 6 (0x6), region = 77 }
  0x68   :  { %199 = vsyncpa [#allocation4], 1 }
  0x69   :  { %201 = vsyncpa [#allocation4 + $0x1], 1 }
  0x6a   :  { %202 = vsyncpa [#allocation5], 1 }
  0x6b   :  { %204 = vsyncpa [#allocation5 + $0x1], 1 }

</bundles_post_ra>
